<compile_context>
chip_gen: v6e
topology: v6e:2x2x1
jax: 0.10.0
libtpu: 0.0.40
codegen_flags: <defaults>
</compile_context>

<pallas_src>
import jax
import jax.numpy as jnp
from jax import lax
from jax.experimental import pallas as pl
from jax.experimental.pallas import tpu as pltpu


def _round_up(x, m):
    return (x + m - 1) // m * m


# Explicit scoped-VMEM cap: above the default scoped limits on v5e/v6e/v7x and
# safely under v7x's 64 MiB physical VMEM.
_VMEM_LIMIT = 48 * 1024 * 1024


# ---------------------------------------------------------------------------
# Tiled (M,K)@(K,N) + bias matmul — hoisted input projection & vocab projection.
# Grid is (N_tiles, M_tiles): M is the INNER axis, so the weight (and bias)
# block index is invariant across the inner loop and each weight column tile is
# fetched exactly once. Both axes are "parallel" (megacore / 2 TCs).
# ---------------------------------------------------------------------------
def _matmul_bias_kernel(a_ref, b_ref, bias_ref, o_ref):
    o_ref[...] = (
        jnp.dot(a_ref[...], b_ref[...], preferred_element_type=jnp.float32)
        + bias_ref[...]
    ).astype(o_ref.dtype)


def _pallas_matmul_bias(a, b, bias, *, out_dtype=jnp.float32, operand_dtype=None,
                        tm=256, tn=512):
    M, K = a.shape
    Kb, N = b.shape
    assert K == Kb
    operand_dtype = b.dtype if operand_dtype is None else operand_dtype
    tm = min(tm, _round_up(M, 8))
    tn = min(tn, _round_up(N, 128))
    Mp = _round_up(M, tm)
    Np = _round_up(N, tn)
    a_p = jnp.pad(a, ((0, Mp - M), (0, 0))).astype(operand_dtype)
    b_p = jnp.pad(b, ((0, 0), (0, Np - N))).astype(operand_dtype)
    bias_p = jnp.pad(bias.reshape(1, N).astype(jnp.float32), ((0, 0), (0, Np - N)))

    out = pl.pallas_call(
        _matmul_bias_kernel,
        out_shape=jax.ShapeDtypeStruct((Mp, Np), out_dtype),
        grid_spec=pltpu.PrefetchScalarGridSpec(
            num_scalar_prefetch=0,
            grid=(Np // tn, Mp // tm),          # M innermost -> W tile never re-streamed
            in_specs=[
                pl.BlockSpec((tm, K), lambda j, i: (i, 0)),
                pl.BlockSpec((K, tn), lambda j, i: (0, j)),   # invariant over inner axis
                pl.BlockSpec((1, tn), lambda j, i: (0, j)),
            ],
            out_specs=pl.BlockSpec((tm, tn), lambda j, i: (i, j)),
        ),
        compiler_params=pltpu.CompilerParams(
            dimension_semantics=("parallel", "parallel"),
            vmem_limit_bytes=_VMEM_LIMIT),
    )(a_p, b_p, bias_p)
    if (Mp, Np) != (M, N):
        out = out[:M, :N]
    return out


# ---------------------------------------------------------------------------
# Recurrent LSTM kernel: Tb time steps per grid invocation; h/c state carried
# in VMEM scratch across the sequential time grid.
# ---------------------------------------------------------------------------
def _lstm_recurrence_kernel(gx_ref, whh_ref, h_out_ref, h_scr, c_scr):
    """gx_ref   : (Tb, Bp, 4*Hp)    precomputed x@W_ih + (b_ih+b_hh), gate-padded
       whh_ref  : (Hp, 4*Hp)        hidden->gate weights (gate k at cols k*Hp..)
       h_out_ref: (Tb, Bp, Hp) f32  hidden states for these Tb steps
       h_scr/c_scr : (Bp, Hp) f32   carried LSTM state (across grid steps)"""
    @pl.when(pl.program_id(0) == 0)
    def _():
        h_scr[...] = jnp.zeros_like(h_scr)
        c_scr[...] = jnp.zeros_like(c_scr)

    w_hh = whh_ref[...]
    hp = h_scr.shape[-1]
    tb = gx_ref.shape[0]

    def step(i, carry):
        del carry
        gates = gx_ref[i].astype(jnp.float32) + jnp.dot(
            h_scr[...].astype(w_hh.dtype), w_hh,
            preferred_element_type=jnp.float32)          # (Bp, 4*Hp) f32
        i_g = jax.nn.sigmoid(gates[:, 0 * hp:1 * hp])    # lane-aligned slices
        f_g = jax.nn.sigmoid(gates[:, 1 * hp:2 * hp])
        g_g = jnp.tanh(gates[:, 2 * hp:3 * hp])
        o_g = jax.nn.sigmoid(gates[:, 3 * hp:4 * hp])
        c_new = f_g * c_scr[...] + i_g * g_g
        h_new = o_g * jnp.tanh(c_new)
        h_scr[...] = h_new
        c_scr[...] = c_new
        h_out_ref[i] = h_new.astype(h_out_ref.dtype)
        return 0

    # Full unroll for short blocks (LLO visibility); partial unroll for long
    # blocks to bound code size / vreg live ranges.
    lax.fori_loop(0, tb, step, 0, unroll=True if tb <= 16 else 8)


def _run_lstm_recurrence(gates_x, w_hh, *, tb, single_buffer_whh):
    tp, bp, g4 = gates_x.shape
    hp = w_hh.shape[0]
    # Grid-invariant W_hh: single-buffer it (double-buffering a never-changing
    # block is pure VMEM waste — matters at large H on v7x/v5e).
    whh_kwargs = dict(pipeline_mode=pl.Buffered(1)) if single_buffer_whh else {}
    return pl.pallas_call(
        _lstm_recurrence_kernel,
        out_shape=jax.ShapeDtypeStruct((tp, bp, hp), jnp.float32),
        grid_spec=pltpu.PrefetchScalarGridSpec(
            num_scalar_prefetch=0,
            grid=(tp // tb,),
            in_specs=[
                pl.BlockSpec((tb, bp, g4), lambda t: (t, 0, 0)),
                pl.BlockSpec((hp, g4), lambda t: (0, 0), **whh_kwargs),
            ],
            out_specs=pl.BlockSpec((tb, bp, hp), lambda t: (t, 0, 0)),
            scratch_shapes=[
                pltpu.VMEM((bp, hp), jnp.float32),   # h state (f32)
                pltpu.VMEM((bp, hp), jnp.float32),   # c state (f32)
            ],
        ),
        compiler_params=pltpu.CompilerParams(
            dimension_semantics=("arbitrary",),      # time is sequential
            vmem_limit_bytes=_VMEM_LIMIT),
        # NOTE: for large batches a leading "parallel" batch-block grid axis
        # would fill the MXU rows and use both TCs; omitted at these sizes.
    )(gates_x, w_hh)


def decoder_rnn_forward(features, captions, params, *,
                        matmul_dtype=jnp.bfloat16, time_block=32):
    """features: (B, E) f32, captions: (B, L) int32 -> logits (B, T, V) f32."""
    B, E = features.shape
    H = params["w_hh"].shape[0]
    V = params["w_out"].shape[1]

    # ---- glue (plain JAX): embedding gather + concat, batch-first (B, T, E)
    caps = captions[:, :-1]
    cap_emb = params["embedding"][caps]
    inputs = jnp.concatenate(
        [features[:, None, :].astype(jnp.float32),
         cap_emb.astype(jnp.float32)], axis=1)
    T = inputs.shape[1]

    # ---- padded / lane-aligned sizes
    Hp = _round_up(H, 128)               # each gate slice = whole 128-lane block
    Vp = _round_up(V, 128)               # lane-dense logits (unmasked stores)
    b_mult = 8 if jnp.dtype(matmul_dtype).itemsize >= 4 else 16   # bf16 packs 16 rows
    Bp = _round_up(B, b_mult)
    Tb = max(1, min(time_block, T))      # time steps per grid invocation
    Tp = _round_up(T, Tb)

    # ---- reorganize / pad weights: gate k occupies columns [k*Hp, k*Hp+H)
    def _pad_gate_cols(w):               # (..., 4H) -> (..., 4*Hp)
        w4 = w.reshape(w.shape[:-1] + (4, H))
        w4 = jnp.pad(w4, [(0, 0)] * (w4.ndim - 1) + [(0, Hp - H)])
        return w4.reshape(w.shape[:-1] + (4 * Hp,))

    w_ih_p = _pad_gate_cols(params["w_ih"])                                # (E, 4Hp)
    w_hh_p = jnp.pad(_pad_gate_cols(params["w_hh"]), ((0, Hp - H), (0, 0)))  # (Hp, 4Hp)
    b_p = _pad_gate_cols((params["b_ih"] + params["b_hh"])[None, :])[0]    # (4Hp,)
    w_out_p = jnp.pad(params["w_out"], ((0, Hp - H), (0, Vp - V)))         # (Hp, Vp)
    b_out_p = jnp.pad(params["b_out"], (0, Vp - V))                        # (Vp,)

    # Padding invariant: padded gate columns & biases are zero, so padded Hp lanes
    # get gates=0 -> i=f=o=0.5, g=0, and with c0=0 those lanes of c/h stay exactly 0.
    # Additionally W_hh / W_out have zero PADDED ROWS, so padded h lanes could never
    # contaminate real outputs even if that invariant were broken.

    # ---- time-major + padded BEFORE the projection: transpose the cheap E-wide
    # input, never the 4*Hp-wide gates. (B,T,E) -> (Tp,Bp,E)
    x_tm = jnp.transpose(inputs, (1, 0, 2))
    x_tm = jnp.pad(x_tm, ((0, Tp - T), (0, Bp - B), (0, 0)))

    # ---- hoisted input projection: ONE tiled MXU matmul; output already in the
    # recurrence layout and in matmul_dtype (halves the recurrence's streamed input).
    gates_x = _pallas_matmul_bias(
        x_tm.reshape(Tp * Bp, E), w_ih_p, b_p,
        out_dtype=matmul_dtype, operand_dtype=matmul_dtype)                # (Tp*Bp, 4Hp)
    gates_x = gates_x.reshape(Tp, Bp, 4 * Hp)

    # ---- sequential recurrence: Tb steps per grid step, state in VMEM scratch
    w_hh_mm = w_hh_p.astype(matmul_dtype)
    try:
        h_all = _run_lstm_recurrence(gates_x, w_hh_mm, tb=Tb, single_buffer_whh=True)
    except Exception:
        # pl.Buffered(1) unsupported on this version -> default double buffering.
        h_all = _run_lstm_recurrence(gates_x, w_hh_mm, tb=Tb, single_buffer_whh=False)

    # ---- hoisted vocab projection: transpose the small Hp-wide h to batch-major
    # so the (much larger) logits need no final transpose; W_out column tiles are
    # fetched once each (M-innermost grid in the helper).
    h_bt = jnp.transpose(h_all, (1, 0, 2)).reshape(Bp * Tp, Hp)            # f32
    logits = _pallas_matmul_bias(h_bt, w_out_p, b_out_p,
                                 out_dtype=jnp.float32, operand_dtype=matmul_dtype)
    return logits.reshape(Bp, Tp, Vp)[:B, :T, :V]                          # (B, T, V)


def _reference_forward(features, captions, params):
    """Pure-JAX reference (lax.scan) for correctness checking."""
    caps = captions[:, :-1]
    cap_emb = params["embedding"][caps]
    inputs = jnp.concatenate([features[:, None, :], cap_emb], axis=1)
    x_tm = jnp.transpose(inputs, (1, 0, 2)).astype(jnp.float32)
    H = params["w_hh"].shape[0]
    b = params["b_ih"] + params["b_hh"]

    def step(carry, x):
        h, c = carry
        gates = x @ params["w_ih"] + h @ params["w_hh"] + b
        i = jax.nn.sigmoid(gates[:, 0 * H:1 * H])
        f = jax.nn.sigmoid(gates[:, 1 * H:2 * H])
        g = jnp.tanh(gates[:, 2 * H:3 * H])
        o = jax.nn.sigmoid(gates[:, 3 * H:4 * H])
        c = f * c + i * g
        h = o * jnp.tanh(c)
        return (h, c), h @ params["w_out"] + params["b_out"]

    B = features.shape[0]
    h0 = jnp.zeros((B, H), jnp.float32)
    c0 = jnp.zeros((B, H), jnp.float32)
    _, out = lax.scan(step, (h0, c0), x_tm)
    return jnp.transpose(out, (1, 0, 2))


def init_params(key, embed_size, hidden_size, vocab_size):
    """Deterministic synthetic parameters, pre-transposed for x @ W."""
    ks = jax.random.split(key, 7)
    scale = 0.1
    return {
        "embedding": scale * jax.random.normal(ks[0], (vocab_size, embed_size), jnp.float32),
        "w_ih": scale * jax.random.normal(ks[1], (embed_size, 4 * hidden_size), jnp.float32),
        "w_hh": scale * jax.random.normal(ks[2], (hidden_size, 4 * hidden_size), jnp.float32),
        "b_ih": scale * jax.random.normal(ks[3], (4 * hidden_size,), jnp.float32),
        "b_hh": scale * jax.random.normal(ks[4], (4 * hidden_size,), jnp.float32),
        "w_out": scale * jax.random.normal(ks[5], (hidden_size, vocab_size), jnp.float32),
        "b_out": scale * jax.random.normal(ks[6], (vocab_size,), jnp.float32),
    }


if __name__ == "__main__":
    # TODO(synk): sample() (greedy autoregressive decoding with .item()) is a
    # host-side loop and is not translated; only forward() is implemented.
    embed_size, hidden_size, vocab_size = 32, 32, 64
    batch, seq = 2, 8   # captions length L=8 -> T = 1 + (L-1) = 8 time steps

    key = jax.random.PRNGKey(0)
    k_feat, k_cap, k_param = jax.random.split(key, 3)

    features = jax.random.normal(k_feat, (batch, embed_size), jnp.float32)
    captions = jax.random.randint(k_cap, (batch, seq), 0, vocab_size, jnp.int32)
    params = init_params(k_param, embed_size, hidden_size, vocab_size)

    ref = jax.block_until_ready(_reference_forward(features, captions, params))

    # f32 matmul-operand path (accuracy check)
    out = jax.block_until_ready(
        decoder_rnn_forward(features, captions, params, matmul_dtype=jnp.float32))
    assert out.shape == (batch, seq, vocab_size)
    assert jnp.allclose(out, ref, atol=5e-3, rtol=5e-3), "f32 mismatch vs reference"

    # bf16 matmul operands (f32 accumulation, f32 LSTM state / h) — default perf path
    out_bf16 = jax.block_until_ready(
        decoder_rnn_forward(features, captions, params, matmul_dtype=jnp.bfloat16))
    assert out_bf16.shape == (batch, seq, vocab_size)
    assert jnp.allclose(out_bf16, ref, atol=5e-2, rtol=5e-2), "bf16 mismatch vs reference"

    print("KERNEL_OK")
</pallas_src>

<mosaic_0001>
module attributes {stable_mosaic.version = 11 : i64} {
  func.func @_matmul_bias_kernel(%arg0: i32, %arg1: i32, %arg2: memref<64x32xf32, #tpu.memory_space<vmem>>, %arg3: memref<32x512xf32, #tpu.memory_space<vmem>>, %arg4: memref<1x512xf32, #tpu.memory_space<vmem>>, %arg5: memref<64x512xf32, #tpu.memory_space<vmem>>) attributes {dimension_semantics = [#tpu.dimension_semantics<parallel>, #tpu.dimension_semantics<parallel>], iteration_bounds = array<i64: 1, 1>, scalar_prefetch = 0 : i64, scratch_operands = 0 : i64, tpu.core_type = #tpu.core_type<tc>, window_params = [{transform_indices = @transform_0, window_bounds = array<i64: 64, 32>}, {transform_indices = @transform_1, window_bounds = array<i64: 32, 512>}, {transform_indices = @transform_2, window_bounds = array<i64: 1, 512>}, {transform_indices = @transform_3, window_bounds = array<i64: 64, 512>}]} {
    %c0 = arith.constant 0 : index
    %c0_0 = arith.constant 0 : index
    %0 = vector.load %arg2[%c0, %c0_0] : memref<64x32xf32, #tpu.memory_space<vmem>>, vector<64x32xf32>
    %c0_1 = arith.constant 0 : index
    %c0_2 = arith.constant 0 : index
    %1 = vector.load %arg3[%c0_1, %c0_2] : memref<32x512xf32, #tpu.memory_space<vmem>>, vector<32x512xf32>
    %cst = arith.constant dense<0.000000e+00> : vector<64x512xf32>
    %2 = tpu.matmul %0, %1, %cst {dimension_numbers = #tpu.dot_dimension_numbers<[1], [0], [0], [1], [0, 0, 1, 1], [], []>} : vector<64x32xf32>, vector<32x512xf32>, vector<64x512xf32> -> vector<64x512xf32>
    %c0_3 = arith.constant 0 : index
    %c0_4 = arith.constant 0 : index
    %3 = vector.load %arg4[%c0_3, %c0_4] : memref<1x512xf32, #tpu.memory_space<vmem>>, vector<1x512xf32>
    %4 = vector.broadcast %3 : vector<1x512xf32> to vector<64x512xf32>
    %5 = arith.addf %2, %4 : vector<64x512xf32>
    %c0_5 = arith.constant 0 : index
    %c0_6 = arith.constant 0 : index
    %6 = vector.load %arg5[%c0_5, %c0_6] : memref<64x512xf32, #tpu.memory_space<vmem>>, vector<64x512xf32>
    tpu.vector_store %arg5[%c0_5, %c0_6], %5 {strides = array<i32>} : memref<64x512xf32, #tpu.memory_space<vmem>>, vector<64x512xf32>,
    return
  }
  func.func @transform_0(%arg0: i32, %arg1: i32) -> (i32, i32) {
    %c0_i32 = arith.constant 0 : i32
    %c0_i32_0 = arith.constant 0 : i32
    return %arg1, %c0_i32 : i32, i32
  }
  func.func @transform_1(%arg0: i32, %arg1: i32) -> (i32, i32) {
    %c0_i32 = arith.constant 0 : i32
    %c0_i32_0 = arith.constant 0 : i32
    return %c0_i32, %arg0 : i32, i32
  }
  func.func @transform_2(%arg0: i32, %arg1: i32) -> (i32, i32) {
    %c0_i32 = arith.constant 0 : i32
    %c0_i32_0 = arith.constant 0 : i32
    return %c0_i32, %arg0 : i32, i32
  }
  func.func @transform_3(%arg0: i32, %arg1: i32) -> (i32, i32) {
    %c0_i32 = arith.constant 0 : i32
    return %arg1, %arg0 : i32, i32
  }
}

</mosaic_0001>

<bundles_post_ra>
// kernel: tpu_custom_call.1
= control target key start
LH: loop header
LB: loop body
LE: loop exit
PB: predicated region body
PF: predicated region fallthrough
CT: control target
= control target key end

     0   :  { %8 = vsyncpa [#allocation3], 0  ;;  %s576_s0 = inlined_call_operand.vmem [shape: f32[64,32], index: 0, kind: input, shape index: {}]   ;;  %s577_s1 = inlined_call_operand.hbm [shape: f32[32,512], index: 1, kind: input, shape index: {}]   ;;  %s578_s2 = inlined_call_operand.vmem [shape: f32[1,512], index: 2, kind: input, shape index: {}]   ;;  %s579_s3 = inlined_call_operand.hbm [shape: f32[64,512], index: 3, kind: output, shape index: {}]  }
   0x1   :  { %9 = vsyncpa [#allocation4], 0  ;;  %s440_s12 = smov [#allocation2]  }
   0x2   :  { %s17_s13 = sshll.u32 %s440_s12, 4  ;;  %s18_s13 = int_to_ptr.vmem [resolvable:$true] %s17_s13 }
   0x3   :  { %s404_s14 = scalar_lea.vmem %s18_s13, 2048  ;;  %p409_p1 = scmp.lt.s32.totalorder %s18_s13, %s18_s13 }
   0x4   :  { %p405_p0 = scmp.ne.s32.totalorder %s18_s13, %s404_s14  ;;  %p410_p2 = scmp.lt.s32.totalorder %s404_s14, %s404_s14 }
   0x6   :  { %p411_p3 = por %p410_p2, %p409_p1 }
   0x8   :  { %p412_p4 = pnand %p411_p3, %p405_p0 }
   0xa   :  { %415 = shalt.err (!%p412_p4)
}
   0xb   :  { %s441_s15 = smov 512   ;;  %s442_s16 = smov 32  }
   0xc   :  { %23 = dma.hbm_to_vmem [thread:$0]  %s577_s1, 2048, %s18_s13, [#allocation3], %s441_s15, %s441_s15, %s442_s16  }
   0xd   :  { %436 = dma.done.wait [#allocation3], 2048  }
   0xe   :  { %437 = vsyncadd [#allocation3], 4294965248  ;;  %v443_v0 = vmov 0.0   ;;  %v50_v1 = vld [vmem:[#allocation2 + $0x68] sm:$0xff]  ;;  %v52_v2 = vld [vmem:[#allocation2 + $0x78] sm:$0xff]  ;;  %vm75_vm0 = vcmask 261120   ;;  %v55_v25 = vlaneseq }
   0xf   :  { %164 = vmatprep.mubr.f32.mxu0 %v443_v0  ;;  %277 = vmatprep.mubr.f32.mxu1 %v443_v0  ;;  %v49_v3 = vld [vmem:[#allocation2 + $0x60] sm:$0xff]  ;;  %v51_v4 = vld [vmem:[#allocation2 + $0x70] sm:$0xff]  ;;  %v46_v5 = vld [vmem:[#allocation2 + $0x48] sm:$0xff] }
  0x10   :  { %124 = vmatprep.subr.mxu0 %v50_v1  ;;  %237 = vmatprep.subr.mxu1 %v52_v2  ;;  %v48_v6 = vld [vmem:[#allocation2 + $0x58] sm:$0xff]  ;;  %v45_v7 = vld [vmem:[#allocation2 + $0x40] sm:$0xff]  ;;  %v47_v8 = vld [vmem:[#allocation2 + $0x50] sm:$0xff]  ;;  %v56_v26 = vshrl.u32 %v55_v25, 7 }
  0x11   :  { %125 = vmatpush1.msra.mxu0 %v49_v3  ;;  %238 = vmatpush1.msra.mxu1 %v51_v4  ;;  %v42_v9 = vld [vmem:[#allocation2 + $0x28] sm:$0xff]  ;;  %v44_v10 = vld [vmem:[#allocation2 + $0x38] sm:$0xff]  ;;  %v41_v11 = vld [vmem:[#allocation2 + $0x20] sm:$0xff] }
  0x12   :  { %126 = vmatprep.subr.mxu0 %v46_v5  ;;  %239 = vmatprep.subr.mxu1 %v48_v6  ;;  %v43_v12 = vld [vmem:[#allocation2 + $0x30] sm:$0xff]  ;;  %v38_v13 = vld [vmem:[#allocation2 + $0x8] sm:$0xff]  ;;  %v40_v14 = vld [vmem:[#allocation2 + $0x18] sm:$0xff]  ;;  %v57_v27 = vsub.s32 0, %v56_v26  ;;  %v65_v28 = vsub.s32 2, %v56_v26  ;;  %v61_v30 = vsub.s32 1, %v56_v26 }
  0x13   :  { %127 = vmatpush1.msra.mxu0 %v45_v7  ;;  %240 = vmatpush1.msra.mxu1 %v47_v8  ;;  %v37_v15 = vld [vmem:[#allocation2] sm:$0xff]  ;;  %v39_v16 = vld [vmem:[#allocation2 + $0x10] sm:$0xff]  ;;  %v30_v18 = vld [vmem:[%s576_s0 + $0x8] sm:$0xff]  ;;  %v69_v31 = vsub.s32 3, %v56_v26 }
  0x14   :  { %128 = vmatprep.subr.mxu0 %v42_v9  ;;  %241 = vmatprep.subr.mxu1 %v44_v10  ;;  %v29_v17 = vld [vmem:[%s576_s0] sm:$0xff]  ;;  %v31_v19 = vld [vmem:[%s576_s0 + $0x10] sm:$0xff]  ;;  %v32_v20 = vld [vmem:[%s576_s0 + $0x18] sm:$0xff] }
  0x15   :  { %129 = vmatpush1.msra.mxu0 %v41_v11  ;;  %242 = vmatpush1.msra.mxu1 %v43_v12  ;;  %v33_v21 = vld [vmem:[%s576_s0 + $0x20] sm:$0xff]  ;;  %v34_v22 = vld [vmem:[%s576_s0 + $0x28] sm:$0xff]  ;;  %v35_v23 = vld [vmem:[%s576_s0 + $0x30] sm:$0xff] }
  0x16   :  { %130 = vmatprep.subr.mxu0 %v38_v13  ;;  %243 = vmatprep.subr.mxu1 %v40_v14  ;;  %v36_v24 = vld [vmem:[%s576_s0 + $0x38] sm:$0xff]  ;;  %v53_v29 = vld [vmem:[%s578_s2] sm:$0xf]  ;;  %s444_s0 = smov [#allocation5]  }
  0x17   :  { %131 = vmatpush1.msra.mxu0 %v37_v15  ;;  %244 = vmatpush1.msra.mxu1 %v39_v16  ;;  %v530_v32 = vrot.slane %v53_v29, %v57_v27  ;;  %v532_v33 = vrot.slane %v53_v29, %v65_v28  ;;  %v534_v34 = vrot.slane %v53_v29, %v61_v30  ;;  %s363_s2 = sshll.u32 %s444_s0, 4  ;;  %s364_s2 = int_to_ptr.vmem [resolvable:$true] %s363_s2 }
  0x18   :  { %375 = vmatmul.mubr.msk.f32.vlgmr.msra.gmra.mxu0 %vm75_vm0, %v29_v17  ;;  %383 = vmatmul.mubr.msk.f32.vlgmr.msra.gmra.mxu1 %vm75_vm0, %v29_v17  ;;  %v536_v35 = vrot.slane %v53_v29, %v69_v31  ;;  %s416_s9 = scalar_lea.vmem %s364_s2, 4096  ;;  %p421_p6 = scmp.lt.s32.totalorder %s364_s2, %s364_s2 }
  0x19   :  { %170 = vmatprep.mubr.f32.mxu0 %v443_v0  ;;  %283 = vmatprep.mubr.f32.mxu1 %v443_v0  ;;  %p417_p5 = scmp.ne.s32.totalorder %s364_s2, %s416_s9  ;;  %p422_p7 = scmp.lt.s32.totalorder %s416_s9, %s416_s9 }
  0x1b   :  { %p423_p8 = por %p422_p7, %p421_p6 }
  0x1c   :  { %376 = vmatmul.mubr.msk.f32.gmra.mxu0 %vm75_vm0, %v30_v18  ;;  %384 = vmatmul.mubr.msk.f32.gmra.mxu1 %vm75_vm0, %v30_v18 }
  0x1d   :  { %176 = vmatprep.mubr.f32.mxu0 %v443_v0  ;;  %289 = vmatprep.mubr.f32.mxu1 %v443_v0  ;;  %p424_p9 = pnand %p423_p8, %p417_p5 }
  0x20   :  { %377 = vmatmul.mubr.msk.f32.gmra.mxu0 %vm75_vm0, %v31_v19  ;;  %385 = vmatmul.mubr.msk.f32.gmra.mxu1 %vm75_vm0, %v31_v19 }
  0x21   :  { %182 = vmatprep.mubr.f32.mxu0 %v443_v0  ;;  %295 = vmatprep.mubr.f32.mxu1 %v443_v0 }
  0x24   :  { %378 = vmatmul.mubr.msk.f32.gmra.mxu0 %vm75_vm0, %v32_v20  ;;  %386 = vmatmul.mubr.msk.f32.gmra.mxu1 %vm75_vm0, %v32_v20 }
  0x25   :  { %188 = vmatprep.mubr.f32.mxu0 %v443_v0  ;;  %301 = vmatprep.mubr.f32.mxu1 %v443_v0 }
  0x28   :  { %379 = vmatmul.mubr.msk.f32.gmra.mxu0 %vm75_vm0, %v33_v21  ;;  %387 = vmatmul.mubr.msk.f32.gmra.mxu1 %vm75_vm0, %v33_v21 }
  0x29   :  { %194 = vmatprep.mubr.f32.mxu0 %v443_v0  ;;  %307 = vmatprep.mubr.f32.mxu1 %v443_v0 }
  0x2c   :  { %380 = vmatmul.mubr.msk.f32.gmra.mxu0 %vm75_vm0, %v34_v22  ;;  %388 = vmatmul.mubr.msk.f32.gmra.mxu1 %vm75_vm0, %v34_v22 }
  0x2d   :  { %200 = vmatprep.mubr.f32.mxu0 %v443_v0  ;;  %313 = vmatprep.mubr.f32.mxu1 %v443_v0 }
  0x30   :  { %381 = vmatmul.mubr.msk.f32.gmra.mxu0 %vm75_vm0, %v35_v23  ;;  %389 = vmatmul.mubr.msk.f32.gmra.mxu1 %vm75_vm0, %v35_v23 }
  0x31   :  { %206 = vmatprep.mubr.f32.mxu0 %v443_v0  ;;  %319 = vmatprep.mubr.f32.mxu1 %v443_v0 }
  0x34   :  { %382 = vmatmul.mubr.msk.f32.gmra.mxu0 %vm75_vm0, %v36_v24  ;;  %390 = vmatmul.mubr.msk.f32.gmra.mxu1 %vm75_vm0, %v36_v24 }
  0xd8   :  { %v166_v36 = vpop.f32.mrf.mxu0  ;;  %v279_v37 = vpop.f32.mrf.mxu1 }
  0xd9   :  { %v167_v38 = vadd.f32 %v166_v36, %v530_v32  ;;  %v280_v39 = vadd.f32 %v279_v37, %v532_v33 }
  0xda   :  { %v168_v40 = vpop.f32.mrf.mxu0  ;;  %v281_v41 = vpop.f32.mrf.mxu1 }
  0xdb   :  { %326 = vst [vmem:[#allocation5] sm:$0xff] %v167_v38  ;;  %328 = vst [vmem:[#allocation5 + $0x10] sm:$0xff] %v280_v39  ;;  %v169_v42 = vadd.f32 %v168_v40, %v534_v34  ;;  %v282_v43 = vadd.f32 %v281_v41, %v536_v35 }
  0xdc   :  { %v172_v44 = vpop.f32.mrf.mxu0  ;;  %v285_v45 = vpop.f32.mrf.mxu1 }
  0xdd   :  { %327 = vst [vmem:[#allocation5 + $0x8] sm:$0xff] %v169_v42  ;;  %329 = vst [vmem:[#allocation5 + $0x18] sm:$0xff] %v282_v43  ;;  %v173_v46 = vadd.f32 %v172_v44, %v530_v32  ;;  %v286_v47 = vadd.f32 %v285_v45, %v532_v33 }
  0xde   :  { %v174_v48 = vpop.f32.mrf.mxu0  ;;  %v287_v49 = vpop.f32.mrf.mxu1 }
  0xdf   :  { %330 = vst [vmem:[#allocation5 + $0x20] sm:$0xff] %v173_v46  ;;  %332 = vst [vmem:[#allocation5 + $0x30] sm:$0xff] %v286_v47  ;;  %v175_v50 = vadd.f32 %v174_v48, %v534_v34  ;;  %v288_v51 = vadd.f32 %v287_v49, %v536_v35 }
  0xe0   :  { %v178_v52 = vpop.f32.mrf.mxu0  ;;  %v291_v53 = vpop.f32.mrf.mxu1 }
  0xe1   :  { %331 = vst [vmem:[#allocation5 + $0x28] sm:$0xff] %v175_v50  ;;  %333 = vst [vmem:[#allocation5 + $0x38] sm:$0xff] %v288_v51  ;;  %v179_v54 = vadd.f32 %v178_v52, %v530_v32  ;;  %v292_v55 = vadd.f32 %v291_v53, %v532_v33 }
  0xe2   :  { %v180_v56 = vpop.f32.mrf.mxu0  ;;  %v293_v57 = vpop.f32.mrf.mxu1 }
  0xe3   :  { %334 = vst [vmem:[#allocation5 + $0x40] sm:$0xff] %v179_v54  ;;  %336 = vst [vmem:[#allocation5 + $0x50] sm:$0xff] %v292_v55  ;;  %v181_v58 = vadd.f32 %v180_v56, %v534_v34  ;;  %v294_v59 = vadd.f32 %v293_v57, %v536_v35 }
  0xe4   :  { %v184_v60 = vpop.f32.mrf.mxu0  ;;  %v297_v61 = vpop.f32.mrf.mxu1 }
  0xe5   :  { %335 = vst [vmem:[#allocation5 + $0x48] sm:$0xff] %v181_v58  ;;  %337 = vst [vmem:[#allocation5 + $0x58] sm:$0xff] %v294_v59  ;;  %v185_v62 = vadd.f32 %v184_v60, %v530_v32  ;;  %v298_v63 = vadd.f32 %v297_v61, %v532_v33 }
  0xe6   :  { %v186_v0 = vpop.f32.mrf.mxu0  ;;  %v299_v1 = vpop.f32.mrf.mxu1 }
  0xe7   :  { %338 = vst [vmem:[#allocation5 + $0x60] sm:$0xff] %v185_v62  ;;  %340 = vst [vmem:[#allocation5 + $0x70] sm:$0xff] %v298_v63  ;;  %v187_v2 = vadd.f32 %v186_v0, %v534_v34  ;;  %v300_v3 = vadd.f32 %v299_v1, %v536_v35 }
  0xe8   :  { %v190_v4 = vpop.f32.mrf.mxu0  ;;  %v303_v5 = vpop.f32.mrf.mxu1 }
  0xe9   :  { %339 = vst [vmem:[#allocation5 + $0x68] sm:$0xff] %v187_v2  ;;  %341 = vst [vmem:[#allocation5 + $0x78] sm:$0xff] %v300_v3  ;;  %v191_v6 = vadd.f32 %v190_v4, %v530_v32  ;;  %v304_v7 = vadd.f32 %v303_v5, %v532_v33 }
  0xea   :  { %v192_v8 = vpop.f32.mrf.mxu0  ;;  %v305_v9 = vpop.f32.mrf.mxu1 }
  0xeb   :  { %342 = vst [vmem:[#allocation5 + $0x80] sm:$0xff] %v191_v6  ;;  %344 = vst [vmem:[#allocation5 + $0x90] sm:$0xff] %v304_v7  ;;  %v193_v10 = vadd.f32 %v192_v8, %v534_v34  ;;  %v306_v11 = vadd.f32 %v305_v9, %v536_v35 }
  0xec   :  { %v196_v12 = vpop.f32.mrf.mxu0  ;;  %v309_v13 = vpop.f32.mrf.mxu1 }
  0xed   :  { %343 = vst [vmem:[#allocation5 + $0x88] sm:$0xff] %v193_v10  ;;  %345 = vst [vmem:[#allocation5 + $0x98] sm:$0xff] %v306_v11  ;;  %v197_v14 = vadd.f32 %v196_v12, %v530_v32  ;;  %v310_v15 = vadd.f32 %v309_v13, %v532_v33 }
  0xee   :  { %v198_v16 = vpop.f32.mrf.mxu0  ;;  %v311_v17 = vpop.f32.mrf.mxu1 }
  0xef   :  { %346 = vst [vmem:[#allocation5 + $0xa0] sm:$0xff] %v197_v14  ;;  %348 = vst [vmem:[#allocation5 + $0xb0] sm:$0xff] %v310_v15  ;;  %v199_v18 = vadd.f32 %v198_v16, %v534_v34  ;;  %v312_v19 = vadd.f32 %v311_v17, %v536_v35 }
  0xf0   :  { %v202_v20 = vpop.f32.mrf.mxu0  ;;  %v315_v21 = vpop.f32.mrf.mxu1 }
  0xf1   :  { %347 = vst [vmem:[#allocation5 + $0xa8] sm:$0xff] %v199_v18  ;;  %349 = vst [vmem:[#allocation5 + $0xb8] sm:$0xff] %v312_v19  ;;  %v203_v22 = vadd.f32 %v202_v20, %v530_v32  ;;  %v316_v23 = vadd.f32 %v315_v21, %v532_v33 }
  0xf2   :  { %v204_v24 = vpop.f32.mrf.mxu0  ;;  %v317_v25 = vpop.f32.mrf.mxu1 }
  0xf3   :  { %350 = vst [vmem:[#allocation5 + $0xc0] sm:$0xff] %v203_v22  ;;  %352 = vst [vmem:[#allocation5 + $0xd0] sm:$0xff] %v316_v23  ;;  %v205_v26 = vadd.f32 %v204_v24, %v534_v34  ;;  %v318_v27 = vadd.f32 %v317_v25, %v536_v35 }
  0xf4   :  { %v208_v28 = vpop.f32.mrf.mxu0  ;;  %v321_v29 = vpop.f32.mrf.mxu1 }
  0xf5   :  { %351 = vst [vmem:[#allocation5 + $0xc8] sm:$0xff] %v205_v26  ;;  %353 = vst [vmem:[#allocation5 + $0xd8] sm:$0xff] %v318_v27  ;;  %v209_v30 = vadd.f32 %v208_v28, %v530_v32  ;;  %v322_v31 = vadd.f32 %v321_v29, %v532_v33 }
  0xf6   :  { %v210_v36 = vpop.f32.mrf.mxu0  ;;  %v323_v37 = vpop.f32.mrf.mxu1 }
  0xf7   :  { %354 = vst [vmem:[#allocation5 + $0xe0] sm:$0xff] %v209_v30  ;;  %356 = vst [vmem:[#allocation5 + $0xf0] sm:$0xff] %v322_v31  ;;  %v211_v38 = vadd.f32 %v210_v36, %v534_v34  ;;  %v324_v39 = vadd.f32 %v323_v37, %v536_v35 }
  0xf9   :  { %355 = vst [vmem:[#allocation5 + $0xe8] sm:$0xff] %v211_v38  ;;  %357 = vst [vmem:[#allocation5 + $0xf8] sm:$0xff] %v324_v39 }
  0xfa   :  { %427 = shalt.err (!%p424_p9)
}
  0xfb   :  { %369 = dma.vmem_to_hbm [thread:$0]  %s364_s2, 4096, %s579_s3, [#allocation4], %s441_s15, %s441_s15, %s442_s16  }
  0xfc   :  { %438 = dma.done.wait [#allocation4], 4096  }
  0xfd   :  { %439 = vsyncadd [#allocation4], 4294963200 }
  0xfe   :  { %373 = vsyncpa [#allocation3], 1 }
  0xff   :  { %374 = vsyncpa [#allocation4], 1 }

</bundles_post_ra>
